<compile_context>
chip_gen: v6e
topology: v6e:2x2x1
jax: 0.10.0
libtpu: 0.0.40
codegen_flags: <defaults>
</compile_context>

<pallas_src>
import numpy as np
import jax
import jax.numpy as jnp
from jax.experimental import pallas as pl
from jax.experimental.pallas import tpu as pltpu

FILTERS = (2, 4, 6)
FILTERS_SIZE = 64
MAX_PAD = max(f // 2 for f in FILTERS)       # 3
N_TAPS = 2 * MAX_PAD                         # 6 distinct input offsets across all filters
SUBLANE = 16                                 # bf16 sublane tile: keeps in-kernel flatten free
VMEM_BUDGET = 12 * 1024 * 1024               # conservative per-step budget (fits v5e default)
VMEM_LIMIT = 32 * 1024 * 1024                # explicit scoped-VMEM limit (safe on all gens)


def _round_up(x, m):
    return (x + m - 1) // m * m


def _conv_relu_kernel(epad_ref, w_ref, bias_ref, out_ref):
    # epad_ref: (L + 2*MAX_PAD, TB, D)  bf16  zero-padded embedded sequence (time-major)
    # w_ref   : (N_TAPS, D, C)          bf16  per-tap weights (zero where a filter lacks a tap)
    # bias_ref: (1, C)                  f32   concatenated biases
    # out_ref : (L + 1, TB, C)          f32 (or bf16)
    l_out, tb, c = out_ref.shape
    t_pad, _, d = epad_ref.shape
    m = l_out * tb

    # Flatten (time, batch) -> rows once; every shifted tap window is then a contiguous,
    # sublane-aligned row slice (TB is a multiple of 16).
    epad = epad_ref[...].reshape(t_pad * tb, d)

    # Six accumulated MXU matmuls with f32 accumulation.  No lane-concat / K padding:
    # the kernel is memory-bound, so the K=32 MXU underfill is free and VMEM/vreg
    # pressure drops versus the im2col pack.
    acc = jnp.dot(epad[0:m, :], w_ref[0], preferred_element_type=jnp.float32)
    for j in range(1, N_TAPS):
        acc = acc + jnp.dot(epad[j * tb:j * tb + m, :], w_ref[j],
                            preferred_element_type=jnp.float32)

    acc = jnp.maximum(acc + bias_ref[...], 0.0)                       # bias + ReLU in f32
    out_ref[...] = acc.reshape(l_out, tb, c).astype(out_ref.dtype)


def _pack_weights(conv_ws, conv_bs, d, c_out):
    """Pack PyTorch Conv1d weights (64, D, f) into one (N_TAPS, D, C) per-tap matrix.

    Tap block j (input offset j in the MAX_PAD-padded buffer), column band of filter f,
    holds kernel tap k = j - (MAX_PAD - f // 2); taps a filter does not use stay zero.
    """
    w_full = np.zeros((N_TAPS, d, c_out), np.float32)
    bias_full = np.zeros((1, c_out), np.float32)
    col = 0
    for f, w, b in zip(FILTERS, conv_ws, conv_bs):
        w = np.asarray(w, np.float32)
        start = MAX_PAD - f // 2
        for k in range(f):
            w_full[start + k, :, col:col + FILTERS_SIZE] = w[:, :, k].T   # (D, 64)
        bias_full[0, col:col + FILTERS_SIZE] = np.asarray(b, np.float32)
        col += FILTERS_SIZE
    return jnp.asarray(w_full, jnp.bfloat16), jnp.asarray(bias_full, jnp.float32)


def _choose_tb(batch, seq_len, d, c_out, block_batch=None):
    """Pick (TB, padded_batch): TB multiple of 16, divides padded batch, fits VMEM budget,
    and leaves >= 2 grid steps whenever batch allows (v7x megacore)."""
    b_pad = _round_up(max(batch, 1), SUBLANE)
    if block_batch is not None:
        tb = _round_up(max(int(block_batch), 1), SUBLANE)
        return tb, _round_up(b_pad, tb)

    t_pad = seq_len + 2 * MAX_PAD
    l_out = seq_len + 1

    def est_bytes(tb):
        in_b = t_pad * tb * d * 2            # bf16 input block
        out_b = l_out * tb * c_out * 4       # f32 output block
        # double-buffered pipeline blocks + ~1x in-kernel temporaries (flatten + acc)
        return 3 * in_b + 3 * out_b

    tb = SUBLANE
    for cand in range(SUBLANE, b_pad + 1, SUBLANE):
        if b_pad % cand:
            continue
        if b_pad >= 2 * SUBLANE and b_pad // cand < 2:
            continue                         # keep >=2 parallel steps for v7x's two TCs
        if est_bytes(cand) <= VMEM_BUDGET:
            tb = cand
    return tb, b_pad


def multi_channel_embedding(x_ids, embed_w, conv_ws, conv_bs, *,
                            block_batch=None, out_dtype=jnp.float32):
    """x_ids: (seq_len, batch) int token ids (PyTorch input layout).

    Returns (seq_len + 1, batch, len(FILTERS) * FILTERS_SIZE) in out_dtype.
    """
    seq_len, batch = x_ids.shape
    d = embed_w.shape[1]
    l_out = seq_len + 1
    c_out = len(FILTERS) * FILTERS_SIZE       # 192: stored exactly, no channel padding

    tb, b_pad = _choose_tb(batch, seq_len, d, c_out, block_batch)

    # Glue: embedding gather (bf16) + shared halo padding, kept in (time, batch, D)
    # layout so the kernel emits the PyTorch (L+1, B, C) layout with no wrapper transpose.
    # TODO(synk): fuse the gather into the kernel (scalar-prefetched ids + VMEM-resident
    # table) and add a halo'd time grid axis for very long sequences instead of only
    # shrinking TB.
    ids = x_ids if b_pad == batch else jnp.pad(x_ids, ((0, 0), (0, b_pad - batch)))
    emb = embed_w.astype(jnp.bfloat16)[ids]                       # (L, B_pad, D)
    epad = jnp.pad(emb, ((MAX_PAD, MAX_PAD), (0, 0), (0, 0)))     # (L + 6, B_pad, D)

    w_taps, bias = _pack_weights(conv_ws, conv_bs, d, c_out)

    t_pad = seq_len + 2 * MAX_PAD
    out = pl.pallas_call(
        _conv_relu_kernel,
        out_shape=jax.ShapeDtypeStruct((l_out, b_pad, c_out), out_dtype),
        grid_spec=pltpu.PrefetchScalarGridSpec(
            num_scalar_prefetch=0,
            grid=(b_pad // tb,),
            in_specs=[
                pl.BlockSpec((t_pad, tb, d), lambda b: (0, b, 0)),
                pl.BlockSpec((N_TAPS, d, c_out), lambda b: (0, 0, 0)),
                pl.BlockSpec((1, c_out), lambda b: (0, 0)),
            ],
            out_specs=pl.BlockSpec((l_out, tb, c_out), lambda b: (0, b, 0)),
        ),
        compiler_params=pltpu.CompilerParams(
            # batch tiles are independent -> shard across v7x's two TensorCores
            dimension_semantics=("parallel",),
            vmem_limit_bytes=VMEM_LIMIT),
    )(epad, w_taps, bias)

    # Only padded batch rows (if any) are dropped; the channel dim is already exact.
    return out if b_pad == batch else out[:, :batch, :]


if __name__ == "__main__":
    vocab, d = 50, 32
    seq_len, batch = 8, 2

    key = jax.random.PRNGKey(0)
    k_emb, k_ids, *k_ws = jax.random.split(key, 2 + 2 * len(FILTERS))

    # Deterministic synthetic parameters (nn.Embedding + nn.Conv1d shapes).
    embed_w = jax.random.normal(k_emb, (vocab, d), jnp.float32) * 0.1
    x_ids = jax.random.randint(k_ids, (seq_len, batch), 0, vocab, jnp.int32)
    conv_ws, conv_bs = [], []
    for i, f in enumerate(FILTERS):
        conv_ws.append(jax.random.normal(k_ws[2 * i], (FILTERS_SIZE, d, f), jnp.float32) * 0.05)
        conv_bs.append(jax.random.normal(k_ws[2 * i + 1], (FILTERS_SIZE,), jnp.float32) * 0.05)

    y = jax.block_until_ready(multi_channel_embedding(x_ids, embed_w, conv_ws, conv_bs))

    # Pure-JAX f32 reference (same math, outside Pallas) for a sanity check.
    emb = embed_w[x_ids.T]                                        # (B, L, D)
    ref_chans = []
    for f, w, b in zip(FILTERS, conv_ws, conv_bs):
        pad = f // 2
        ep = jnp.pad(emb, ((0, 0), (pad, pad), (0, 0)))
        acc = jnp.zeros((batch, seq_len + 1, FILTERS_SIZE), jnp.float32)
        for k in range(f):
            acc = acc + jnp.einsum("bld,od->blo", ep[:, k:k + seq_len + 1, :], w[:, :, k])
        ref_chans.append(acc + b[None, None, :])
    ref = jnp.transpose(jnp.maximum(jnp.concatenate(ref_chans, axis=-1), 0.0), (1, 0, 2))

    assert y.shape == (seq_len + 1, batch, 3 * FILTERS_SIZE)
    # Tolerance reflects the deliberate bf16 operand cast (f32 accumulation); pure-f32
    # math would match to ~1e-5, bf16 inputs at these scales land around ~1e-3 abs error.
    assert np.allclose(np.asarray(y), np.asarray(ref), atol=1e-2, rtol=1e-2)
    print("KERNEL_OK")
</pallas_src>

<mosaic_0001>
module attributes {stable_mosaic.version = 11 : i64} {
  func.func @_conv_relu_kernel(%arg0: i32, %arg1: memref<14x16x32xbf16, #tpu.memory_space<vmem>>, %arg2: memref<6x32x192xbf16, #tpu.memory_space<vmem>>, %arg3: memref<1x192xf32, #tpu.memory_space<vmem>>, %arg4: memref<9x16x192xf32, #tpu.memory_space<vmem>>) attributes {dimension_semantics = [#tpu.dimension_semantics<parallel>], iteration_bounds = array<i64: 1>, scalar_prefetch = 0 : i64, scratch_operands = 0 : i64, tpu.core_type = #tpu.core_type<tc>, window_params = [{transform_indices = @transform_0, window_bounds = array<i64: 14, 16, 32>}, {pipeline_mode = #tpu.pipeline_mode<synchronous>, transform_indices = @transform_1, window_bounds = array<i64: 6, 32, 192>}, {pipeline_mode = #tpu.pipeline_mode<synchronous>, transform_indices = @transform_2, window_bounds = array<i64: 1, 192>}, {transform_indices = @transform_3, window_bounds = array<i64: 9, 16, 192>}]} {
    %c0 = arith.constant 0 : index
    %c0_0 = arith.constant 0 : index
    %c0_1 = arith.constant 0 : index
    %0 = vector.load %arg1[%c0, %c0_0, %c0_1] : memref<14x16x32xbf16, #tpu.memory_space<vmem>>, vector<14x16x32xbf16>
    %1 = vector.shape_cast %0 : vector<14x16x32xbf16> to vector<224x32xbf16>
    %2 = vector.extract_strided_slice %1 {offsets = [0, 0], sizes = [144, 32], strides = [1, 1]} : vector<224x32xbf16> to vector<144x32xbf16>
    %c0_2 = arith.constant 0 : index
    %c0_3 = arith.constant 0 : index
    %c0_4 = arith.constant 0 : index
    %3 = vector.load %arg2[%c0_2, %c0_3, %c0_4] : memref<6x32x192xbf16, #tpu.memory_space<vmem>>, vector<1x32x192xbf16>
    %4 = vector.shape_cast %3 : vector<1x32x192xbf16> to vector<32x192xbf16>
    %cst = arith.constant dense<0.000000e+00> : vector<144x192xf32>
    %5 = tpu.matmul %2, %4, %cst {dimension_numbers = #tpu.dot_dimension_numbers<[1], [0], [0], [1], [0, 0, 1, 1], [], []>} : vector<144x32xbf16>, vector<32x192xbf16>, vector<144x192xf32> -> vector<144x192xf32>
    %6 = vector.extract_strided_slice %1 {offsets = [16, 0], sizes = [144, 32], strides = [1, 1]} : vector<224x32xbf16> to vector<144x32xbf16>
    %c1 = arith.constant 1 : index
    %c0_5 = arith.constant 0 : index
    %c0_6 = arith.constant 0 : index
    %7 = vector.load %arg2[%c1, %c0_5, %c0_6] : memref<6x32x192xbf16, #tpu.memory_space<vmem>>, vector<1x32x192xbf16>
    %8 = vector.shape_cast %7 : vector<1x32x192xbf16> to vector<32x192xbf16>
    %cst_7 = arith.constant dense<0.000000e+00> : vector<144x192xf32>
    %9 = tpu.matmul %6, %8, %cst_7 {dimension_numbers = #tpu.dot_dimension_numbers<[1], [0], [0], [1], [0, 0, 1, 1], [], []>} : vector<144x32xbf16>, vector<32x192xbf16>, vector<144x192xf32> -> vector<144x192xf32>
    %10 = arith.addf %5, %9 : vector<144x192xf32>
    %11 = vector.extract_strided_slice %1 {offsets = [32, 0], sizes = [144, 32], strides = [1, 1]} : vector<224x32xbf16> to vector<144x32xbf16>
    %c2 = arith.constant 2 : index
    %c0_8 = arith.constant 0 : index
    %c0_9 = arith.constant 0 : index
    %12 = vector.load %arg2[%c2, %c0_8, %c0_9] : memref<6x32x192xbf16, #tpu.memory_space<vmem>>, vector<1x32x192xbf16>
    %13 = vector.shape_cast %12 : vector<1x32x192xbf16> to vector<32x192xbf16>
    %cst_10 = arith.constant dense<0.000000e+00> : vector<144x192xf32>
    %14 = tpu.matmul %11, %13, %cst_10 {dimension_numbers = #tpu.dot_dimension_numbers<[1], [0], [0], [1], [0, 0, 1, 1], [], []>} : vector<144x32xbf16>, vector<32x192xbf16>, vector<144x192xf32> -> vector<144x192xf32>
    %15 = arith.addf %10, %14 : vector<144x192xf32>
    %16 = vector.extract_strided_slice %1 {offsets = [48, 0], sizes = [144, 32], strides = [1, 1]} : vector<224x32xbf16> to vector<144x32xbf16>
    %c3 = arith.constant 3 : index
    %c0_11 = arith.constant 0 : index
    %c0_12 = arith.constant 0 : index
    %17 = vector.load %arg2[%c3, %c0_11, %c0_12] : memref<6x32x192xbf16, #tpu.memory_space<vmem>>, vector<1x32x192xbf16>
    %18 = vector.shape_cast %17 : vector<1x32x192xbf16> to vector<32x192xbf16>
    %cst_13 = arith.constant dense<0.000000e+00> : vector<144x192xf32>
    %19 = tpu.matmul %16, %18, %cst_13 {dimension_numbers = #tpu.dot_dimension_numbers<[1], [0], [0], [1], [0, 0, 1, 1], [], []>} : vector<144x32xbf16>, vector<32x192xbf16>, vector<144x192xf32> -> vector<144x192xf32>
    %20 = arith.addf %15, %19 : vector<144x192xf32>
    %21 = vector.extract_strided_slice %1 {offsets = [64, 0], sizes = [144, 32], strides = [1, 1]} : vector<224x32xbf16> to vector<144x32xbf16>
    %c4 = arith.constant 4 : index
    %c0_14 = arith.constant 0 : index
    %c0_15 = arith.constant 0 : index
    %22 = vector.load %arg2[%c4, %c0_14, %c0_15] : memref<6x32x192xbf16, #tpu.memory_space<vmem>>, vector<1x32x192xbf16>
    %23 = vector.shape_cast %22 : vector<1x32x192xbf16> to vector<32x192xbf16>
    %cst_16 = arith.constant dense<0.000000e+00> : vector<144x192xf32>
    %24 = tpu.matmul %21, %23, %cst_16 {dimension_numbers = #tpu.dot_dimension_numbers<[1], [0], [0], [1], [0, 0, 1, 1], [], []>} : vector<144x32xbf16>, vector<32x192xbf16>, vector<144x192xf32> -> vector<144x192xf32>
    %25 = arith.addf %20, %24 : vector<144x192xf32>
    %26 = vector.extract_strided_slice %1 {offsets = [80, 0], sizes = [144, 32], strides = [1, 1]} : vector<224x32xbf16> to vector<144x32xbf16>
    %c5 = arith.constant 5 : index
    %c0_17 = arith.constant 0 : index
    %c0_18 = arith.constant 0 : index
    %27 = vector.load %arg2[%c5, %c0_17, %c0_18] : memref<6x32x192xbf16, #tpu.memory_space<vmem>>, vector<1x32x192xbf16>
    %28 = vector.shape_cast %27 : vector<1x32x192xbf16> to vector<32x192xbf16>
    %cst_19 = arith.constant dense<0.000000e+00> : vector<144x192xf32>
    %29 = tpu.matmul %26, %28, %cst_19 {dimension_numbers = #tpu.dot_dimension_numbers<[1], [0], [0], [1], [0, 0, 1, 1], [], []>} : vector<144x32xbf16>, vector<32x192xbf16>, vector<144x192xf32> -> vector<144x192xf32>
    %30 = arith.addf %25, %29 : vector<144x192xf32>
    %c0_20 = arith.constant 0 : index
    %c0_21 = arith.constant 0 : index
    %31 = vector.load %arg3[%c0_20, %c0_21] : memref<1x192xf32, #tpu.memory_space<vmem>>, vector<1x192xf32>
    %32 = vector.broadcast %31 : vector<1x192xf32> to vector<144x192xf32>
    %33 = arith.addf %30, %32 : vector<144x192xf32>
    %cst_22 = arith.constant 0.000000e+00 : f32
    %34 = vector.broadcast %cst_22 : f32 to vector<144x192xf32>
    %35 = arith.maximumf %33, %34 : vector<144x192xf32>
    %36 = vector.shape_cast %35 : vector<144x192xf32> to vector<9x16x192xf32>
    %c0_23 = arith.constant 0 : index
    %c0_24 = arith.constant 0 : index
    %c0_25 = arith.constant 0 : index
    %37 = vector.load %arg4[%c0_23, %c0_24, %c0_25] : memref<9x16x192xf32, #tpu.memory_space<vmem>>, vector<9x16x192xf32>
    tpu.vector_store %arg4[%c0_23, %c0_24, %c0_25], %36 {strides = array<i32>} : memref<9x16x192xf32, #tpu.memory_space<vmem>>, vector<9x16x192xf32>,
    return
  }
  func.func @transform_0(%arg0: i32) -> (i32, i32, i32) {
    %c0_i32 = arith.constant 0 : i32
    %c0_i32_0 = arith.constant 0 : i32
    %c0_i32_1 = arith.constant 0 : i32
    return %c0_i32, %arg0, %c0_i32_0 : i32, i32, i32
  }
  func.func @transform_1(%arg0: i32) -> (i32, i32, i32) {
    %c0_i32 = arith.constant 0 : i32
    %c0_i32_0 = arith.constant 0 : i32
    %c0_i32_1 = arith.constant 0 : i32
    %c0_i32_2 = arith.constant 0 : i32
    return %c0_i32, %c0_i32_0, %c0_i32_1 : i32, i32, i32
  }
  func.func @transform_2(%arg0: i32) -> (i32, i32) {
    %c0_i32 = arith.constant 0 : i32
    %c0_i32_0 = arith.constant 0 : i32
    %c0_i32_1 = arith.constant 0 : i32
    return %c0_i32, %c0_i32_0 : i32, i32
  }
  func.func @transform_3(%arg0: i32) -> (i32, i32, i32) {
    %c0_i32 = arith.constant 0 : i32
    %c0_i32_0 = arith.constant 0 : i32
    %c0_i32_1 = arith.constant 0 : i32
    return %c0_i32, %arg0, %c0_i32_0 : i32, i32, i32
  }
}

</mosaic_0001>

<bundles_post_ra>
// kernel: tpu_custom_call.1
= control target key start
LH: loop header
LB: loop body
LE: loop exit
PB: predicated region body
PF: predicated region fallthrough
CT: control target
= control target key end

     0   :  { %8 = vsyncpa [#allocation3], 0  ;;  %s2043_s0 = inlined_call_operand.hbm [shape: bf16[14,16,32], index: 0, kind: input, shape index: {}]   ;;  %s2044_s1 = inlined_call_operand.hbm [shape: bf16[6,32,192], index: 1, kind: input, shape index: {}]   ;;  %s2045_s2 = inlined_call_operand.vmem [shape: f32[1,192], index: 2, kind: input, shape index: {}]   ;;  %s2046_s3 = inlined_call_operand.hbm [shape: f32[9,16,192], index: 3, kind: output, shape index: {}]  }
   0x1   :  { %9 = vsyncpa [#allocation6], 0 }
   0x2   :  { %10 = vsyncpa [#allocation4], 0  ;;  %s1573_s12 = smov [#allocation2]  }
   0x3   :  { %s16_s13 = sshll.u32 %s1573_s12, 4  ;;  %s17_s13 = int_to_ptr.vmem [resolvable:$true] %s16_s13 }
   0x4   :  { %s1515_s14 = scalar_lea.vmem %s17_s13, 1792  ;;  %p1520_p1 = scmp.lt.s32.totalorder %s17_s13, %s17_s13 }
   0x5   :  { %p1516_p0 = scmp.ne.s32.totalorder %s17_s13, %s1515_s14  ;;  %p1521_p2 = scmp.lt.s32.totalorder %s1515_s14, %s1515_s14 }
   0x7   :  { %p1522_p3 = por %p1521_p2, %p1520_p1 }
   0x9   :  { %p1523_p4 = pnand %p1522_p3, %p1516_p0 }
   0xb   :  { %1526 = shalt.err (!%p1523_p4)
}
   0xc   :  { %s1574_s15 = smov 64   ;;  %s1575_s16 = smov 4  }
   0xd   :  { %22 = dma.hbm_to_vmem [thread:$0]  %s2043_s0, 1792, %s17_s13, [#allocation3], %s1574_s15, %s1574_s15, %s1575_s16  }
   0xe   :  { %s1576_s19 = smov [#allocation5]  }
   0xf   :  { %s28_s20 = sshll.u32 %s1576_s19, 4  ;;  %s29_s20 = int_to_ptr.vmem [resolvable:$true] %s28_s20 }
  0x10   :  { %s1535_s21 = scalar_lea.vmem %s29_s20, 3072  ;;  %p1540_p6 = scmp.lt.s32.totalorder %s29_s20, %s29_s20 }
  0x11   :  { %p1536_p5 = scmp.ne.s32.totalorder %s29_s20, %s1535_s21  ;;  %p1541_p7 = scmp.lt.s32.totalorder %s1535_s21, %s1535_s21 }
  0x13   :  { %p1542_p8 = por %p1541_p7, %p1540_p6 }
  0x15   :  { %p1543_p9 = pnand %p1542_p8, %p1536_p5 }
  0x17   :  { %1546 = shalt.err (!%p1543_p9)
}
  0x18   :  { %s1577_s22 = smov 128   ;;  %s1578_s23 = smov 8  }
  0x19   :  { %34 = dma.hbm_to_vmem [thread:$0]  %s2044_s1, 3072, %s29_s20, [#allocation6], %s1577_s22, %s1577_s22, %s1578_s23  }
  0x1a   :  { %1567 = dma.done.wait [#allocation3], 1792  }
  0x1b   :  { %1568 = vsyncadd [#allocation3], 4294965504 }
  0x1c   :  { %1569 = dma.done.wait [#allocation6], 3072  }
  0x1d   :  { %1570 = vsyncadd [#allocation6], 4294964224  ;;  %v1579_v0 = vmov 0   ;;  %v1457_v1 = vld [vmem:[#allocation5 + $0x34] ss:$8 sps:$4 sm:$0xff]   ;;  %vm146_vm0 = vcmask 261120  }
  0x1e   :  { %206 = vmatprep.mubr.bf16.mxu0 %v1579_v0  ;;  %357 = vmatprep.mubr.bf16.mxu1 %v1579_v0  ;;  %v1459_v2 = vld [vmem:[#allocation5 + $0x14] ss:$8 sps:$4 sm:$0xff]   ;;  %v1461_v3 = vld [vmem:[#allocation5 + $0x30] ss:$8 sps:$4 sm:$0xff]   ;;  %v1463_v5 = vld [vmem:[#allocation5 + $0x24] ss:$8 sps:$4 sm:$0xff]  }
  0x1f   :  { %186 = vmatprep.subr.bf16.mxu0 %v1457_v1  ;;  %v1462_v4 = vld [vmem:[#allocation5 + $0x10] ss:$8 sps:$4 sm:$0xff]   ;;  %337 = vmatprep.subr.bf16.mxu1 %v1459_v2  ;;  %v1465_v6 = vld [vmem:[#allocation5 + $0x4] ss:$8 sps:$4 sm:$0xff]   ;;  %v1467_v7 = vld [vmem:[#allocation5 + $0x20] ss:$8 sps:$4 sm:$0xff]  }
  0x20   :  { %187 = vmatpush1.bf16.msra.mxu0 %v1461_v3  ;;  %338 = vmatpush1.bf16.msra.mxu1 %v1462_v4  ;;  %v1468_v8 = vld [vmem:[#allocation5] ss:$8 sps:$4 sm:$0xff]   ;;  %v1469_v9 = vld [vmem:[#allocation2 + $0x8] sm:$0xff]   ;;  %v1470_v10 = vld [vmem:[#allocation2] sm:$0xff]   ;;  %vm1301_vm1 = vcmask 523264  }
  0x21   :  { %188 = vmatprep.subr.bf16.mxu0 %v1463_v5  ;;  %339 = vmatprep.subr.bf16.mxu1 %v1465_v6  ;;  %v1471_v11 = vld [vmem:[#allocation5 + $0x50] ss:$8 sps:$4 sm:$0xff]   ;;  %v1473_v12 = vld [vmem:[#allocation5 + $0x54] ss:$8 sps:$4 sm:$0xff]   ;;  %v1477_v15 = vld [vmem:[#allocation2 + $0x10] sm:$0xff]  }
  0x22   :  { %v1474_v13 = vld [vmem:[#allocation5 + $0x70] ss:$8 sps:$4 sm:$0xff]   ;;  %v1476_v14 = vld [vmem:[#allocation5 + $0x74] ss:$8 sps:$4 sm:$0xff]   ;;  %v1481_v16 = vld [vmem:[#allocation5 + $0x40] ss:$8 sps:$4 sm:$0xff]  }
  0x23   :  { %v1483_v17 = vld [vmem:[#allocation5 + $0x44] ss:$8 sps:$4 sm:$0xff]   ;;  %v1484_v19 = vld [vmem:[#allocation5 + $0x60] ss:$8 sps:$4 sm:$0xff]   ;;  %v1493_v20 = vld [vmem:[#allocation5 + $0x94] ss:$8 sps:$4 sm:$0xff]  }
  0x24   :  { %189 = vmatpush1.bf16.msra.mxu0 %v1467_v7  ;;  %340 = vmatpush1.bf16.msra.mxu1 %v1468_v8  ;;  %v1486_v18 = vld [vmem:[#allocation5 + $0x64] ss:$8 sps:$4 sm:$0xff]   ;;  %v1496_v22 = vld [vmem:[#allocation5 + $0xb4] ss:$8 sps:$4 sm:$0xff]   ;;  %v1491_v29 = vld [vmem:[#allocation5 + $0x90] ss:$8 sps:$4 sm:$0xff]  }
  0x25   :  { %493 = vmatprep.subr.bf16.mxu0 %v1473_v12  ;;  %685 = vmatprep.subr.bf16.mxu1 %v1476_v14  ;;  %v1478_v21 = vld [vmem:[#allocation2 + $0x18] sm:$0xff]   ;;  %v1623_v23 = vld [vmem:[#allocation2 + $0x20] sm:$0xff]   ;;  %v1630_v24 = vld [vmem:[#allocation2 + $0x28] sm:$0xff]  }
  0x26   :  { %v1638_v25 = vld [vmem:[#allocation2 + $0x30] sm:$0xff]   ;;  %v1646_v26 = vld [vmem:[#allocation2 + $0x38] sm:$0xff]   ;;  %v1654_v27 = vld [vmem:[#allocation2 + $0x40] sm:$0xff]  }
  0x27   :  { %1368 = vmatmul.mubr.msk.bf16.vlgmr.msra.gmra.mxu0 %vm146_vm0, %v1469_v9  ;;  %1382 = vmatmul.mubr.msk.bf16.vlgmr.msra.gmra.mxu1 %vm146_vm0, %v1470_v10  ;;  %v1662_v28 = vld [vmem:[#allocation2 + $0x48] sm:$0xff]   ;;  %v1499_v31 = vld [vmem:[#allocation5 + $0x84] ss:$8 sps:$4 sm:$0xff]   ;;  %v1497_v33 = vld [vmem:[#allocation5 + $0x80] ss:$8 sps:$4 sm:$0xff]  }
  0x28   :  { %494 = vmatpush1.bf16.msra.mxu0 %v1471_v11  ;;  %686 = vmatpush1.bf16.msra.mxu1 %v1474_v13  ;;  %v1494_v30 = vld [vmem:[#allocation5 + $0xb0] ss:$8 sps:$4 sm:$0xff]   ;;  %v1502_v32 = vld [vmem:[#allocation5 + $0xa4] ss:$8 sps:$4 sm:$0xff]   ;;  %v1500_v34 = vld [vmem:[#allocation5 + $0xa0] ss:$8 sps:$4 sm:$0xff]  }
  0x29   :  { %216 = vmatprep.mubr.bf16.mxu0 %v1579_v0  ;;  %367 = vmatprep.mubr.bf16.mxu1 %v1579_v0  ;;  %v1503_v35 = vld [vmem:[#allocation2 + $0x50] sm:$0xff]   ;;  %v1504_v36 = vld [vmem:[#allocation2 + $0x58] sm:$0xff]   ;;  %v1505_v45 = vld [vmem:[#allocation2 + $0x60] sm:$0xff]  }
  0x2a   :  { %495 = vmatprep.subr.bf16.mxu0 %v1483_v17  ;;  %687 = vmatprep.subr.bf16.mxu1 %v1486_v18  ;;  %v1506_v58 = vld [vmem:[#allocation2 + $0x68] sm:$0xff]  }
  0x2c   :  { %496 = vmatpush1.bf16.msra.mxu0 %v1481_v16  ;;  %688 = vmatpush1.bf16.msra.mxu1 %v1484_v19 }
  0x2d   :  { %877 = vmatprep.subr.bf16.mxu0 %v1493_v20  ;;  %1069 = vmatprep.subr.bf16.mxu1 %v1496_v22 }
  0x2f   :  { %1369 = vmatmul.mubr.msk.bf16.gmra.mxu0 %vm146_vm0, %v1477_v15  ;;  %1383 = vmatmul.mubr.msk.bf16.gmra.mxu1 %vm146_vm0, %v1469_v9 }
  0x30   :  { %226 = vmatprep.mubr.bf16.mxu0 %v1579_v0  ;;  %377 = vmatprep.mubr.bf16.mxu1 %v1579_v0 }
  0x37   :  { %1370 = vmatmul.mubr.msk.bf16.gmra.mxu0 %vm146_vm0, %v1478_v21  ;;  %1384 = vmatmul.mubr.msk.bf16.gmra.mxu1 %vm146_vm0, %v1477_v15 }
  0x38   :  { %236 = vmatprep.mubr.bf16.mxu0 %v1579_v0  ;;  %387 = vmatprep.mubr.bf16.mxu1 %v1579_v0 }
  0x3f   :  { %1371 = vmatmul.mubr.msk.bf16.gmra.mxu0 %vm146_vm0, %v1623_v23  ;;  %1385 = vmatmul.mubr.msk.bf16.gmra.mxu1 %vm146_vm0, %v1478_v21 }
  0x40   :  { %246 = vmatprep.mubr.bf16.mxu0 %v1579_v0  ;;  %397 = vmatprep.mubr.bf16.mxu1 %v1579_v0 }
  0x47   :  { %1372 = vmatmul.mubr.msk.bf16.gmra.mxu0 %vm146_vm0, %v1630_v24  ;;  %1386 = vmatmul.mubr.msk.bf16.gmra.mxu1 %vm146_vm0, %v1623_v23 }
  0x48   :  { %256 = vmatprep.mubr.bf16.mxu0 %v1579_v0  ;;  %407 = vmatprep.mubr.bf16.mxu1 %v1579_v0 }
  0x4f   :  { %1373 = vmatmul.mubr.msk.bf16.gmra.mxu0 %vm146_vm0, %v1638_v25  ;;  %1387 = vmatmul.mubr.msk.bf16.gmra.mxu1 %vm146_vm0, %v1630_v24 }
  0x50   :  { %266 = vmatprep.mubr.bf16.mxu0 %v1579_v0  ;;  %417 = vmatprep.mubr.bf16.mxu1 %v1579_v0 }
  0x57   :  { %1374 = vmatmul.mubr.msk.bf16.gmra.mxu0 %vm146_vm0, %v1646_v26  ;;  %1388 = vmatmul.mubr.msk.bf16.gmra.mxu1 %vm146_vm0, %v1638_v25 }
  0x58   :  { %276 = vmatprep.mubr.bf16.mxu0 %v1579_v0  ;;  %427 = vmatprep.mubr.bf16.mxu1 %v1579_v0 }
  0x5f   :  { %1375 = vmatmul.mubr.msk.bf16.gmra.mxu0 %vm146_vm0, %v1654_v27  ;;  %1389 = vmatmul.mubr.msk.bf16.gmra.mxu1 %vm146_vm0, %v1646_v26 }
  0x60   :  { %286 = vmatprep.mubr.bf16.mxu0 %v1579_v0  ;;  %437 = vmatprep.mubr.bf16.mxu1 %v1579_v0 }
  0x67   :  { %1376 = vmatmul.mubr.msk.bf16.gmra.mxu0 %vm146_vm0, %v1662_v28  ;;  %1390 = vmatmul.mubr.msk.bf16.gmra.mxu1 %vm146_vm0, %v1654_v27 }
  0x68   :  { %513 = vmatprep.mubr.bf16.mxu0 %v1579_v0  ;;  %705 = vmatprep.mubr.bf16.mxu1 %v1579_v0 }
  0x6f   :  { %1396 = vmatmul.mubr.msk.bf16.vlgmr.msra.gmra.mxu0 %vm146_vm0, %v1477_v15  ;;  %1410 = vmatmul.mubr.msk.bf16.vlgmr.msra.gmra.mxu1 %vm146_vm0, %v1478_v21 }
  0x70   :  { %878 = vmatpush1.bf16.msra.mxu0 %v1491_v29  ;;  %1070 = vmatpush1.bf16.msra.mxu1 %v1494_v30 }
  0x71   :  { %523 = vmatprep.mubr.bf16.mxu0 %v1579_v0  ;;  %715 = vmatprep.mubr.bf16.mxu1 %v1579_v0 }
  0x72   :  { %879 = vmatprep.subr.bf16.mxu0 %v1499_v31  ;;  %1071 = vmatprep.subr.bf16.mxu1 %v1502_v32 }
  0x74   :  { %880 = vmatpush1.bf16.msra.mxu0 %v1497_v33  ;;  %1072 = vmatpush1.bf16.msra.mxu1 %v1500_v34 }
  0x77   :  { %1397 = vmatmul.mubr.msk.bf16.gmra.mxu0 %vm146_vm0, %v1478_v21  ;;  %1411 = vmatmul.mubr.msk.bf16.gmra.mxu1 %vm146_vm0, %v1623_v23 }
  0x78   :  { %533 = vmatprep.mubr.bf16.mxu0 %v1579_v0  ;;  %725 = vmatprep.mubr.bf16.mxu1 %v1579_v0 }
  0x7f   :  { %1398 = vmatmul.mubr.msk.bf16.gmra.mxu0 %vm146_vm0, %v1623_v23  ;;  %1412 = vmatmul.mubr.msk.bf16.gmra.mxu1 %vm146_vm0, %v1630_v24 }
  0x80   :  { %543 = vmatprep.mubr.bf16.mxu0 %v1579_v0  ;;  %735 = vmatprep.mubr.bf16.mxu1 %v1579_v0 }
  0x87   :  { %1399 = vmatmul.mubr.msk.bf16.gmra.mxu0 %vm146_vm0, %v1630_v24  ;;  %1413 = vmatmul.mubr.msk.bf16.gmra.mxu1 %vm146_vm0, %v1638_v25 }
  0x88   :  { %553 = vmatprep.mubr.bf16.mxu0 %v1579_v0  ;;  %745 = vmatprep.mubr.bf16.mxu1 %v1579_v0 }
  0x8f   :  { %1400 = vmatmul.mubr.msk.bf16.gmra.mxu0 %vm146_vm0, %v1638_v25  ;;  %1414 = vmatmul.mubr.msk.bf16.gmra.mxu1 %vm146_vm0, %v1646_v26 }
  0x90   :  { %563 = vmatprep.mubr.bf16.mxu0 %v1579_v0  ;;  %755 = vmatprep.mubr.bf16.mxu1 %v1579_v0 }
  0x97   :  { %1401 = vmatmul.mubr.msk.bf16.gmra.mxu0 %vm146_vm0, %v1646_v26  ;;  %1415 = vmatmul.mubr.msk.bf16.gmra.mxu1 %vm146_vm0, %v1654_v27 }
  0x98   :  { %573 = vmatprep.mubr.bf16.mxu0 %v1579_v0  ;;  %765 = vmatprep.mubr.bf16.mxu1 %v1579_v0 }
  0x9f   :  { %1402 = vmatmul.mubr.msk.bf16.gmra.mxu0 %vm146_vm0, %v1654_v27  ;;  %1416 = vmatmul.mubr.msk.bf16.gmra.mxu1 %vm146_vm0, %v1662_v28 }
  0xa0   :  { %583 = vmatprep.mubr.bf16.mxu0 %v1579_v0  ;;  %775 = vmatprep.mubr.bf16.mxu1 %v1579_v0 }
  0xa7   :  { %1403 = vmatmul.mubr.msk.bf16.gmra.mxu0 %vm146_vm0, %v1662_v28  ;;  %1417 = vmatmul.mubr.msk.bf16.gmra.mxu1 %vm146_vm0, %v1503_v35 }
  0xa8   :  { %593 = vmatprep.mubr.bf16.mxu0 %v1579_v0  ;;  %785 = vmatprep.mubr.bf16.mxu1 %v1579_v0 }
  0xaf   :  { %1404 = vmatmul.mubr.msk.bf16.gmra.mxu0 %vm146_vm0, %v1503_v35  ;;  %1418 = vmatmul.mubr.msk.bf16.gmra.mxu1 %vm146_vm0, %v1504_v36 }
  0xb0   :  { %897 = vmatprep.mubr.bf16.mxu0 %v1579_v0  ;;  %1089 = vmatprep.mubr.bf16.mxu1 %v1579_v0 }
  0xb7   :  { %1424 = vmatmul.mubr.msk.bf16.vlgmr.msra.gmra.mxu0 %vm146_vm0, %v1623_v23  ;;  %1438 = vmatmul.mubr.msk.bf16.vlgmr.msra.gmra.mxu1 %vm146_vm0, %v1630_v24 }
  0xb8   :  { %907 = vmatprep.mubr.bf16.mxu0 %v1579_v0  ;;  %1099 = vmatprep.mubr.bf16.mxu1 %v1579_v0 }
  0xbf   :  { %1425 = vmatmul.mubr.msk.bf16.gmra.mxu0 %vm146_vm0, %v1630_v24  ;;  %1439 = vmatmul.mubr.msk.bf16.gmra.mxu1 %vm146_vm0, %v1638_v25 }
  0xc0   :  { %917 = vmatprep.mubr.bf16.mxu0 %v1579_v0  ;;  %1109 = vmatprep.mubr.bf16.mxu1 %v1579_v0 }
  0xc7   :  { %1426 = vmatmul.mubr.msk.bf16.gmra.mxu0 %vm146_vm0, %v1638_v25  ;;  %1440 = vmatmul.mubr.msk.bf16.gmra.mxu1 %vm146_vm0, %v1646_v26 }
  0xc8   :  { %927 = vmatprep.mubr.bf16.mxu0 %v1579_v0  ;;  %1119 = vmatprep.mubr.bf16.mxu1 %v1579_v0 }
  0xcf   :  { %1427 = vmatmul.mubr.msk.bf16.gmra.mxu0 %vm146_vm0, %v1646_v26  ;;  %1441 = vmatmul.mubr.msk.bf16.gmra.mxu1 %vm146_vm0, %v1654_v27 }
  0xd0   :  { %937 = vmatprep.mubr.bf16.mxu0 %v1579_v0  ;;  %1129 = vmatprep.mubr.bf16.mxu1 %v1579_v0 }
  0xd7   :  { %1428 = vmatmul.mubr.msk.bf16.gmra.mxu0 %vm146_vm0, %v1654_v27  ;;  %1442 = vmatmul.mubr.msk.bf16.gmra.mxu1 %vm146_vm0, %v1662_v28 }
  0xd8   :  { %947 = vmatprep.mubr.bf16.mxu0 %v1579_v0  ;;  %1139 = vmatprep.mubr.bf16.mxu1 %v1579_v0 }
  0xdf   :  { %1429 = vmatmul.mubr.msk.bf16.gmra.mxu0 %vm146_vm0, %v1662_v28  ;;  %1443 = vmatmul.mubr.msk.bf16.gmra.mxu1 %vm146_vm0, %v1503_v35 }
  0xe0   :  { %957 = vmatprep.mubr.bf16.mxu0 %v1579_v0  ;;  %1149 = vmatprep.mubr.bf16.mxu1 %v1579_v0 }
  0xe7   :  { %v208_v37 = vpop.f32.mrf.mxu0  ;;  %v359_v38 = vpop.f32.mrf.mxu1  ;;  %1430 = vmatmul.mubr.msk.bf16.gmra.mxu0 %vm146_vm0, %v1503_v35  ;;  %1444 = vmatmul.mubr.msk.bf16.gmra.mxu1 %vm146_vm0, %v1504_v36 }
  0xe8   :  { %v1755_v39 = vadd.f32 %v359_v38, %v208_v37  ;;  %967 = vmatprep.mubr.bf16.mxu0 %v1579_v0  ;;  %1159 = vmatprep.mubr.bf16.mxu1 %v1579_v0 }
  0xe9   :  { %v210_v40 = vpop.f32.mrf.mxu0  ;;  %v361_v41 = vpop.f32.mrf.mxu1 }
  0xea   :  { %v1759_v42 = vadd.f32 %v361_v41, %v210_v40 }
  0xeb   :  { %v212_v43 = vpop.f32.mrf.mxu0  ;;  %v363_v44 = vpop.f32.mrf.mxu1 }
  0xec   :  { %v1761_v46 = vadd.f32 %v363_v44, %v212_v43 }
  0xed   :  { %v214_v47 = vpop.f32.mrf.mxu0  ;;  %v365_v48 = vpop.f32.mrf.mxu1 }
  0xee   :  { %v1763_v49 = vadd.f32 %v365_v48, %v214_v47 }
  0xef   :  { %v218_v50 = vpop.f32.mrf.mxu0  ;;  %v369_v51 = vpop.f32.mrf.mxu1  ;;  %1431 = vmatmul.mubr.msk.bf16.gmra.mxu0 %vm146_vm0, %v1504_v36  ;;  %1445 = vmatmul.mubr.msk.bf16.gmra.mxu1 %vm146_vm0, %v1505_v45 }
  0xf0   :  { %v1767_v52 = vadd.f32 %v369_v51, %v218_v50  ;;  %977 = vmatprep.mubr.bf16.mxu0 %v1579_v0  ;;  %1169 = vmatprep.mubr.bf16.mxu1 %v1579_v0 }
  0xf1   :  { %v220_v53 = vpop.f32.mrf.mxu0  ;;  %v371_v54 = vpop.f32.mrf.mxu1 }
  0xf2   :  { %v1771_v55 = vadd.f32 %v371_v54, %v220_v53 }
  0xf3   :  { %v222_v56 = vpop.f32.mrf.mxu0  ;;  %v373_v57 = vpop.f32.mrf.mxu1 }
  0xf4   :  { %v1773_v59 = vadd.f32 %v373_v57, %v222_v56 }
  0xf5   :  { %v224_v60 = vpop.f32.mrf.mxu0  ;;  %v375_v61 = vpop.f32.mrf.mxu1 }
  0xf6   :  { %v1775_v62 = vadd.f32 %v375_v61, %v224_v60 }
  0xf7   :  { %v228_v63 = vpop.f32.mrf.mxu0  ;;  %v379_v1 = vpop.f32.mrf.mxu1  ;;  %1432 = vmatmul.mubr.msk.bf16.gmra.mxu0 %vm146_vm0, %v1505_v45  ;;  %1446 = vmatmul.mubr.msk.bf16.gmra.mxu1 %vm146_vm0, %v1506_v58 }
  0xf8   :  { %v1779_v0 = vadd.f32 %v379_v1, %v228_v63 }
  0xf9   :  { %v230_v2 = vpop.f32.mrf.mxu0  ;;  %v381_v3 = vpop.f32.mrf.mxu1 }
  0xfa   :  { %v1781_v4 = vadd.f32 %v381_v3, %v230_v2 }
  0xfb   :  { %v232_v5 = vpop.f32.mrf.mxu0  ;;  %v383_v6 = vpop.f32.mrf.mxu1 }
  0xfc   :  { %v1783_v7 = vadd.f32 %v383_v6, %v232_v5 }
  0xfd   :  { %v234_v8 = vpop.f32.mrf.mxu0  ;;  %v385_v9 = vpop.f32.mrf.mxu1 }
  0xfe   :  { %v1785_v10 = vadd.f32 %v385_v9, %v234_v8 }
  0xff   :  { %v238_v11 = vpop.f32.mrf.mxu0  ;;  %v389_v12 = vpop.f32.mrf.mxu1 }
 0x100   :  { %v1787_v13 = vadd.f32 %v389_v12, %v238_v11 }
 0x101   :  { %v240_v14 = vpop.f32.mrf.mxu0  ;;  %v391_v15 = vpop.f32.mrf.mxu1 }
 0x102   :  { %v1789_v16 = vadd.f32 %v391_v15, %v240_v14 }
 0x103   :  { %v242_v17 = vpop.f32.mrf.mxu0  ;;  %v393_v18 = vpop.f32.mrf.mxu1 }
 0x104   :  { %v1791_v19 = vadd.f32 %v393_v18, %v242_v17 }
 0x105   :  { %v244_v20 = vpop.f32.mrf.mxu0  ;;  %v395_v21 = vpop.f32.mrf.mxu1 }
 0x106   :  { %v1793_v22 = vadd.f32 %v395_v21, %v244_v20 }
 0x107   :  { %v248_v23 = vpop.f32.mrf.mxu0  ;;  %v399_v24 = vpop.f32.mrf.mxu1 }
 0x108   :  { %v1795_v25 = vadd.f32 %v399_v24, %v248_v23 }
 0x109   :  { %v250_v26 = vpop.f32.mrf.mxu0  ;;  %v401_v27 = vpop.f32.mrf.mxu1 }
 0x10a   :  { %v1797_v28 = vadd.f32 %v401_v27, %v250_v26 }
 0x10b   :  { %v252_v29 = vpop.f32.mrf.mxu0  ;;  %v403_v30 = vpop.f32.mrf.mxu1 }
 0x10c   :  { %v1799_v31 = vadd.f32 %v403_v30, %v252_v29 }
 0x10d   :  { %v254_v32 = vpop.f32.mrf.mxu0  ;;  %v405_v33 = vpop.f32.mrf.mxu1 }
 0x10e   :  { %v1801_v34 = vadd.f32 %v405_v33, %v254_v32 }
 0x10f   :  { %v258_v35 = vpop.f32.mrf.mxu0  ;;  %v409_v36 = vpop.f32.mrf.mxu1 }
 0x110   :  { %v1803_v37 = vadd.f32 %v409_v36, %v258_v35 }
 0x111   :  { %v260_v38 = vpop.f32.mrf.mxu0  ;;  %v411_v40 = vpop.f32.mrf.mxu1 }
 0x112   :  { %v1805_v41 = vadd.f32 %v411_v40, %v260_v38 }
 0x113   :  { %v262_v43 = vpop.f32.mrf.mxu0  ;;  %v413_v44 = vpop.f32.mrf.mxu1 }
 0x114   :  { %v1807_v45 = vadd.f32 %v413_v44, %v262_v43 }
 0x115   :  { %v264_v47 = vpop.f32.mrf.mxu0  ;;  %v415_v48 = vpop.f32.mrf.mxu1 }
 0x116   :  { %v1809_v50 = vadd.f32 %v415_v48, %v264_v47 }
 0x117   :  { %v268_v51 = vpop.f32.mrf.mxu0  ;;  %v419_v53 = vpop.f32.mrf.mxu1 }
 0x118   :  { %v1811_v54 = vadd.f32 %v419_v53, %v268_v51 }
 0x119   :  { %v270_v56 = vpop.f32.mrf.mxu0  ;;  %v421_v57 = vpop.f32.mrf.mxu1 }
 0x11a   :  { %v1813_v58 = vadd.f32 %v421_v57, %v270_v56 }
 0x11b   :  { %v272_v60 = vpop.f32.mrf.mxu0  ;;  %v423_v61 = vpop.f32.mrf.mxu1 }
 0x11c   :  { %v1815_v63 = vadd.f32 %v423_v61, %v272_v60 }
 0x11d   :  { %v274_v1 = vpop.f32.mrf.mxu0  ;;  %v425_v2 = vpop.f32.mrf.mxu1 }
 0x11e   :  { %v1817_v3 = vadd.f32 %v425_v2, %v274_v1 }
 0x11f   :  { %v278_v5 = vpop.f32.mrf.mxu0  ;;  %v429_v6 = vpop.f32.mrf.mxu1 }
 0x120   :  { %v1819_v8 = vadd.f32 %v429_v6, %v278_v5 }
 0x121   :  { %v280_v9 = vpop.f32.mrf.mxu0  ;;  %v431_v11 = vpop.f32.mrf.mxu1 }
 0x122   :  { %v1821_v12 = vadd.f32 %v431_v11, %v280_v9 }
 0x123   :  { %v282_v14 = vpop.f32.mrf.mxu0  ;;  %v433_v15 = vpop.f32.mrf.mxu1 }
 0x124   :  { %v1823_v17 = vadd.f32 %v433_v15, %v282_v14 }
 0x125   :  { %v284_v18 = vpop.f32.mrf.mxu0  ;;  %v435_v20 = vpop.f32.mrf.mxu1 }
 0x126   :  { %v1825_v21 = vadd.f32 %v435_v20, %v284_v18 }
 0x127   :  { %v288_v23 = vpop.f32.mrf.mxu0  ;;  %v439_v24 = vpop.f32.mrf.mxu1 }
 0x128   :  { %v1827_v26 = vadd.f32 %v439_v24, %v288_v23 }
 0x129   :  { %v290_v27 = vpop.f32.mrf.mxu0  ;;  %v441_v29 = vpop.f32.mrf.mxu1 }
 0x12a   :  { %v1829_v30 = vadd.f32 %v441_v29, %v290_v27 }
 0x12b   :  { %v292_v32 = vpop.f32.mrf.mxu0  ;;  %v443_v33 = vpop.f32.mrf.mxu1 }
 0x12c   :  { %v1831_v35 = vadd.f32 %v443_v33, %v292_v32 }
 0x12d   :  { %v294_v36 = vpop.f32.mrf.mxu0  ;;  %v445_v38 = vpop.f32.mrf.mxu1 }
 0x12e   :  { %v1833_v40 = vadd.f32 %v445_v38, %v294_v36 }
 0x12f   :  { %v515_v43 = vpop.f32.mrf.mxu0  ;;  %v707_v44 = vpop.f32.mrf.mxu1 }
 0x130   :  { %v604_v47 = vadd.f32 %v515_v43, %v1755_v39 }
 0x131   :  { %v517_v48 = vpop.f32.mrf.mxu0  ;;  %v709_v51 = vpop.f32.mrf.mxu1 }
 0x132   :  { %v1836_v53 = vadd.f32 %v707_v44, %v604_v47  ;;  %v605_v56 = vadd.f32 %v517_v48, %v1759_v42 }
 0x133   :  { %v519_v57 = vpop.f32.mrf.mxu0  ;;  %v711_v60 = vpop.f32.mrf.mxu1 }
 0x134   :  { %v1839_v61 = vadd.f32 %v709_v51, %v605_v56  ;;  %v606_v1 = vadd.f32 %v519_v57, %v1761_v46 }
 0x135   :  { %v521_v2 = vpop.f32.mrf.mxu0  ;;  %v713_v5 = vpop.f32.mrf.mxu1 }
 0x136   :  { %v1842_v6 = vadd.f32 %v711_v60, %v606_v1  ;;  %v607_v9 = vadd.f32 %v521_v2, %v1763_v49 }
 0x137   :  { %v525_v11 = vpop.f32.mrf.mxu0  ;;  %v717_v39 = vpop.f32.mrf.mxu1 }
 0x138   :  { %v1845_v14 = vadd.f32 %v713_v5, %v607_v9  ;;  %v608_v15 = vadd.f32 %v525_v11, %v1767_v52 }
 0x139   :  { %v527_v18 = vpop.f32.mrf.mxu0  ;;  %v719_v42 = vpop.f32.mrf.mxu1 }
 0x13a   :  { %v1848_v20 = vadd.f32 %v717_v39, %v608_v15  ;;  %v609_v23 = vadd.f32 %v527_v18, %v1771_v55 }
 0x13b   :  { %v529_v24 = vpop.f32.mrf.mxu0  ;;  %v721_v46 = vpop.f32.mrf.mxu1 }
 0x13c   :  { %v1851_v27 = vadd.f32 %v719_v42, %v609_v23  ;;  %v610_v29 = vadd.f32 %v529_v24, %v1773_v59 }
 0x13d   :  { %v531_v32 = vpop.f32.mrf.mxu0  ;;  %v723_v49 = vpop.f32.mrf.mxu1 }
 0x13e   :  { %v1854_v33 = vadd.f32 %v721_v46, %v610_v29  ;;  %v611_v36 = vadd.f32 %v531_v32, %v1775_v62 }
 0x13f   :  { %v535_v38 = vpop.f32.mrf.mxu0  ;;  %v727_v52 = vpop.f32.mrf.mxu1 }
 0x140   :  { %v1857_v43 = vadd.f32 %v723_v49, %v611_v36  ;;  %v612_v44 = vadd.f32 %v535_v38, %v1779_v0 }
 0x141   :  { %v537_v47 = vpop.f32.mrf.mxu0  ;;  %v729_v55 = vpop.f32.mrf.mxu1 }
 0x142   :  { %v1860_v48 = vadd.f32 %v727_v52, %v612_v44  ;;  %v613_v51 = vadd.f32 %v537_v47, %v1781_v4 }
 0x143   :  { %v539_v56 = vpop.f32.mrf.mxu0  ;;  %v731_v59 = vpop.f32.mrf.mxu1 }
 0x144   :  { %v1863_v57 = vadd.f32 %v729_v55, %v613_v51  ;;  %v614_v60 = vadd.f32 %v539_v56, %v1783_v7 }
 0x145   :  { %v541_v1 = vpop.f32.mrf.mxu0  ;;  %v733_v62 = vpop.f32.mrf.mxu1 }
 0x146   :  { %v1866_v2 = vadd.f32 %v731_v59, %v614_v60  ;;  %v615_v5 = vadd.f32 %v541_v1, %v1785_v10 }
 0x147   :  { %v545_v9 = vpop.f32.mrf.mxu0  ;;  %v737_v0 = vpop.f32.mrf.mxu1 }
 0x148   :  { %v1869_v11 = vadd.f32 %v733_v62, %v615_v5  ;;  %v616_v39 = vadd.f32 %v545_v9, %v1787_v13 }
 0x149   :  { %v547_v15 = vpop.f32.mrf.mxu0  ;;  %v739_v4 = vpop.f32.mrf.mxu1 }
 0x14a   :  { %v1872_v18 = vadd.f32 %v737_v0, %v616_v39  ;;  %v617_v42 = vadd.f32 %v547_v15, %v1789_v16 }
 0x14b   :  { %v549_v23 = vpop.f32.mrf.mxu0  ;;  %v741_v7 = vpop.f32.mrf.mxu1 }
 0x14c   :  { %v1875_v24 = vadd.f32 %v739_v4, %v617_v42  ;;  %v618_v46 = vadd.f32 %v549_v23, %v1791_v19 }
 0x14d   :  { %v551_v29 = vpop.f32.mrf.mxu0  ;;  %v743_v10 = vpop.f32.mrf.mxu1 }
 0x14e   :  { %v1878_v32 = vadd.f32 %v741_v7, %v618_v46  ;;  %v619_v49 = vadd.f32 %v551_v29, %v1793_v22 }
 0x14f   :  { %v555_v36 = vpop.f32.mrf.mxu0  ;;  %v747_v13 = vpop.f32.mrf.mxu1 }
 0x150   :  { %v1881_v38 = vadd.f32 %v743_v10, %v619_v49  ;;  %v620_v52 = vadd.f32 %v555_v36, %v1795_v25 }
 0x151   :  { %v557_v44 = vpop.f32.mrf.mxu0  ;;  %v749_v16 = vpop.f32.mrf.mxu1 }
 0x152   :  { %v1884_v47 = vadd.f32 %v747_v13, %v620_v52  ;;  %v621_v55 = vadd.f32 %v557_v44, %v1797_v28 }
 0x153   :  { %v559_v51 = vpop.f32.mrf.mxu0  ;;  %v751_v19 = vpop.f32.mrf.mxu1 }
 0x154   :  { %v1887_v56 = vadd.f32 %v749_v16, %v621_v55  ;;  %v622_v59 = vadd.f32 %v559_v51, %v1799_v31 }
 0x155   :  { %v561_v60 = vpop.f32.mrf.mxu0  ;;  %v753_v22 = vpop.f32.mrf.mxu1 }
 0x156   :  { %v1890_v1 = vadd.f32 %v751_v19, %v622_v59  ;;  %v623_v62 = vadd.f32 %v561_v60, %v1801_v34 }
 0x157   :  { %v565_v5 = vpop.f32.mrf.mxu0  ;;  %v757_v25 = vpop.f32.mrf.mxu1 }
 0x158   :  { %v1893_v9 = vadd.f32 %v753_v22, %v623_v62  ;;  %v624_v0 = vadd.f32 %v565_v5, %v1803_v37 }
 0x159   :  { %v567_v39 = vpop.f32.mrf.mxu0  ;;  %v759_v28 = vpop.f32.mrf.mxu1 }
 0x15a   :  { %v1896_v15 = vadd.f32 %v757_v25, %v624_v0  ;;  %v625_v4 = vadd.f32 %v567_v39, %v1805_v41 }
 0x15b   :  { %v569_v42 = vpop.f32.mrf.mxu0  ;;  %v761_v31 = vpop.f32.mrf.mxu1 }
 0x15c   :  { %v1899_v23 = vadd.f32 %v759_v28, %v625_v4  ;;  %v626_v7 = vadd.f32 %v569_v42, %v1807_v45 }
 0x15d   :  { %v571_v46 = vpop.f32.mrf.mxu0  ;;  %v763_v34 = vpop.f32.mrf.mxu1 }
 0x15e   :  { %v1902_v29 = vadd.f32 %v761_v31, %v626_v7  ;;  %v627_v10 = vadd.f32 %v571_v46, %v1809_v50  ;;  %v1218_v7 = vlaneseq }
 0x15f   :  { %v575_v49 = vpop.f32.mrf.mxu0  ;;  %v767_v37 = vpop.f32.mrf.mxu1 }
 0x160   :  { %v1905_v36 = vadd.f32 %v763_v34, %v627_v10  ;;  %v628_v13 = vadd.f32 %v575_v49, %v1811_v54 }
 0x161   :  { %v577_v52 = vpop.f32.mrf.mxu0  ;;  %v769_v41 = vpop.f32.mrf.mxu1 }
 0x162   :  { %v1908_v44 = vadd.f32 %v767_v37, %v628_v13  ;;  %v629_v16 = vadd.f32 %v577_v52, %v1813_v58 }
 0x163   :  { %v579_v55 = vpop.f32.mrf.mxu0  ;;  %v771_v45 = vpop.f32.mrf.mxu1 }
 0x164   :  { %v1911_v51 = vadd.f32 %v769_v41, %v629_v16  ;;  %v630_v19 = vadd.f32 %v579_v55, %v1815_v63 }
 0x165   :  { %v581_v59 = vpop.f32.mrf.mxu0  ;;  %v773_v50 = vpop.f32.mrf.mxu1 }
 0x166   :  { %v1914_v60 = vadd.f32 %v771_v45, %v630_v19  ;;  %v631_v22 = vadd.f32 %v581_v59, %v1817_v3 }
 0x167   :  { %v585_v62 = vpop.f32.mrf.mxu0  ;;  %v777_v54 = vpop.f32.mrf.mxu1 }
 0x168   :  { %v1917_v5 = vadd.f32 %v773_v50, %v631_v22  ;;  %v632_v25 = vadd.f32 %v585_v62, %v1819_v8 }
 0x169   :  { %v587_v0 = vpop.f32.mrf.mxu0  ;;  %v779_v58 = vpop.f32.mrf.mxu1 }
 0x16a   :  { %v1920_v39 = vadd.f32 %v777_v54, %v632_v25  ;;  %v633_v28 = vadd.f32 %v587_v0, %v1821_v12  ;;  %v1219_v12 = vshrl.u32 %v1218_v7, 7 }
 0x16b   :  { %v589_v4 = vpop.f32.mrf.mxu0  ;;  %v781_v63 = vpop.f32.mrf.mxu1 }
 0x16c   :  { %v1923_v42 = vadd.f32 %v779_v58, %v633_v28  ;;  %v634_v31 = vadd.f32 %v589_v4, %v1823_v17  ;;  %v1224_v25 = vsub.s32 1, %v1219_v12 }
 0x16d   :  { %v591_v3 = vpop.f32.mrf.mxu0  ;;  %v783_v46 = vpop.f32.mrf.mxu1 }
 0x16e   :  { %v1926_v34 = vadd.f32 %v781_v63, %v634_v31  ;;  %v635_v10 = vadd.f32 %v591_v3, %v1825_v21  ;;  %v1220_v21 = vsub.s32 0, %v1219_v12 }
 0x16f   :  { %v595_v8 = vpop.f32.mrf.mxu0  ;;  %v787_v49 = vpop.f32.mrf.mxu1 }
 0x170   :  { %v1929_v37 = vadd.f32 %v783_v46, %v635_v10  ;;  %v636_v13 = vadd.f32 %v595_v8, %v1827_v26  ;;  %v1216_v26 = vld [vmem:[%s2045_s2] sm:$0x3]  ;;  %s1580_s2 = smov [#allocation7]  }
 0x171   :  { %v597_v52 = vpop.f32.mrf.mxu0  ;;  %v789_v41 = vpop.f32.mrf.mxu1  ;;  %v1947_v4 = vrot.slane %v1216_v26, %v1220_v21  ;;  %v1950_v3 = vrot.slane %v1216_v26, %v1224_v25  ;;  %s1342_s26 = sshll.u32 %s1580_s2, 4  ;;  %s1343_s26 = int_to_ptr.vmem [resolvable:$true] %s1342_s26 }
 0x172   :  { %v1932_v16 = vadd.f32 %v787_v49, %v636_v13  ;;  %v637_v17 = vadd.f32 %v597_v52, %v1829_v30  ;;  %s1547_s27 = scalar_lea.vmem %s1343_s26, 4608  ;;  %p1552_p11 = scmp.lt.s32.totalorder %s1343_s26, %s1343_s26 }
 0x173   :  { %v599_v55 = vpop.f32.mrf.mxu0  ;;  %v791_v45 = vpop.f32.mrf.mxu1  ;;  %p1548_p10 = scmp.ne.s32.totalorder %s1343_s26, %s1547_s27  ;;  %p1553_p12 = scmp.lt.s32.totalorder %s1547_s27, %s1547_s27 }
 0x174   :  { %v1935_v19 = vadd.f32 %v789_v41, %v637_v17  ;;  %v638_v59 = vadd.f32 %v599_v55, %v1831_v35 }
 0x175   :  { %v601_v50 = vpop.f32.mrf.mxu0  ;;  %v793_v22 = vpop.f32.mrf.mxu1  ;;  %p1554_p13 = por %p1553_p12, %p1552_p11 }
 0x176   :  { %v1941_v62 = vadd.f32 %v791_v45, %v638_v59  ;;  %v639_v54 = vadd.f32 %v601_v50, %v1833_v40 }
 0x177   :  { %v899_v0 = vpop.f32.mrf.mxu0  ;;  %v1091_v30 = vpop.f32.mrf.mxu1  ;;  %p1555_p0 = pnand %p1554_p13, %p1548_p10 }
 0x178   :  { %v1944_v58 = vadd.f32 %v793_v22, %v639_v54  ;;  %v988_v28 = vadd.f32 %v899_v0, %v1836_v53 }
 0x179   :  { %v901_v35 = vpop.f32.mrf.mxu0  ;;  %v1093_v63 = vpop.f32.mrf.mxu1 }
 0x17a   :  { %v1180_v31 = vadd.f32 %v1091_v30, %v988_v28  ;;  %v989_v7 = vadd.f32 %v901_v35, %v1839_v61 }
 0x17b   :  { %v903_v46 = vpop.f32.mrf.mxu0  ;;  %v1095_v10 = vpop.f32.mrf.mxu1 }
 0x17c   :  { %v1228_v40 = vadd.f32 %v1947_v4, %v1180_v31  ;;  %v1181_v8 = vadd.f32 %v1093_v63, %v989_v7  ;;  %v990_v49 = vadd.f32 %v903_v46, %v1842_v6 }
 0x17d   :  { %v905_v13 = vpop.f32.mrf.mxu0  ;;  %v1097_v12 = vpop.f32.mrf.mxu1 }
 0x17e   :  { %v1264_v52 = vmax.f32 %v1228_v40, 0.0  ;;  %v1229_v53 = vadd.f32 %v1950_v3, %v1181_v8  ;;  %v1182_v41 = vadd.f32 %v1095_v10, %v990_v49  ;;  %v991_v17 = vadd.f32 %v905_v13, %v1845_v14 }
 0x17f   :  { %v909_v55 = vpop.f32.mrf.mxu0  ;;  %v1101_v61 = vpop.f32.mrf.mxu1 }
 0x180   :  { %1300 = vst [vmem:[#allocation7] sm:$0xff] %v1264_v52  ;;  %v1265_v45 = vmax.f32 %v1229_v53, 0.0  ;;  %v1230_v59 = vadd.f32 %v1947_v4, %v1182_v41  ;;  %v1183_v21 = vadd.f32 %v1097_v12, %v991_v17  ;;  %v992_v50 = vadd.f32 %v909_v55, %v1848_v20 }
 0x181   :  { %v911_v22 = vpop.f32.mrf.mxu0  ;;  %v1103_v6 = vpop.f32.mrf.mxu1 }
 0x182   :  { %1302 = vst.msk [vmem:[#allocation7 + $0x8] sm:$0xff] %vm1301_vm1, %v1265_v45  ;;  %v1266_v26 = vmax.f32 %v1230_v59, 0.0  ;;  %v1231_v54 = vadd.f32 %v1950_v3, %v1183_v21  ;;  %v1184_v25 = vadd.f32 %v1101_v61, %v992_v50  ;;  %v993_v14 = vadd.f32 %v911_v22, %v1851_v27 }
 0x183   :  { %v913_v0 = vpop.f32.mrf.mxu0  ;;  %v1105_v30 = vpop.f32.mrf.mxu1 }
 0x184   :  { %1303 = vst [vmem:[#allocation7 + $0x10] sm:$0xff] %v1266_v26  ;;  %v1267_v28 = vmax.f32 %v1231_v54, 0.0  ;;  %v1232_v35 = vadd.f32 %v1947_v4, %v1184_v25  ;;  %v1185_v63 = vadd.f32 %v1103_v6, %v993_v14  ;;  %v994_v31 = vadd.f32 %v913_v0, %v1854_v33 }
 0x185   :  { %v915_v20 = vpop.f32.mrf.mxu0  ;;  %v1107_v7 = vpop.f32.mrf.mxu1 }
 0x186   :  { %1304 = vst.msk [vmem:[#allocation7 + $0x18] sm:$0xff] %vm1301_vm1, %v1267_v28  ;;  %v1268_v46 = vmax.f32 %v1232_v35, 0.0  ;;  %v1233_v10 = vadd.f32 %v1950_v3, %v1185_v63  ;;  %v1186_v40 = vadd.f32 %v1105_v30, %v994_v31  ;;  %v995_v8 = vadd.f32 %v915_v20, %v1857_v43 }
 0x187   :  { %v919_v27 = vpop.f32.mrf.mxu0  ;;  %v1111_v49 = vpop.f32.mrf.mxu1 }
 0x188   :  { %1305 = vst [vmem:[#allocation7 + $0x20] sm:$0xff] %v1268_v46  ;;  %v1269_v13 = vmax.f32 %v1233_v10, 0.0  ;;  %v1234_v12 = vadd.f32 %v1947_v4, %v1186_v40  ;;  %v1187_v52 = vadd.f32 %v1107_v7, %v995_v8  ;;  %v996_v53 = vadd.f32 %v919_v27, %v1860_v48 }
 0x189   :  { %v921_v33 = vpop.f32.mrf.mxu0  ;;  %v1113_v41 = vpop.f32.mrf.mxu1 }
 0x18a   :  { %1306 = vst.msk [vmem:[#allocation7 + $0x28] sm:$0xff] %vm1301_vm1, %v1269_v13  ;;  %v1270_v17 = vmax.f32 %v1234_v12, 0.0  ;;  %v1235_v55 = vadd.f32 %v1950_v3, %v1187_v52  ;;  %v1188_v61 = vadd.f32 %v1111_v49, %v996_v53  ;;  %v997_v45 = vadd.f32 %v921_v33, %v1863_v57 }
 0x18b   :  { %v923_v43 = vpop.f32.mrf.mxu0  ;;  %v1115_v59 = vpop.f32.mrf.mxu1 }
 0x18c   :  { %1307 = vst [vmem:[#allocation7 + $0x30] sm:$0xff] %v1270_v17  ;;  %v1271_v21 = vmax.f32 %v1235_v55, 0.0  ;;  %v1236_v50 = vadd.f32 %v1947_v4, %v1188_v61  ;;  %v1189_v22 = vadd.f32 %v1113_v41, %v997_v45  ;;  %v998_v6 = vadd.f32 %v923_v43, %v1866_v2 }
 0x18d   :  { %v925_v48 = vpop.f32.mrf.mxu0  ;;  %v1117_v26 = vpop.f32.mrf.mxu1 }
 0x18e   :  { %1308 = vst.msk [vmem:[#allocation7 + $0x38] sm:$0xff] %vm1301_vm1, %v1271_v21  ;;  %v1272_v54 = vmax.f32 %v1236_v50, 0.0  ;;  %v1237_v25 = vadd.f32 %v1950_v3, %v1189_v22  ;;  %v1190_v14 = vadd.f32 %v1115_v59, %v998_v6  ;;  %v999_v0 = vadd.f32 %v925_v48, %v1869_v11 }
 0x18f   :  { %v929_v57 = vpop.f32.mrf.mxu0  ;;  %v1121_v30 = vpop.f32.mrf.mxu1 }
 0x190   :  { %1309 = vst [vmem:[#allocation7 + $0x40] sm:$0xff] %v1272_v54  ;;  %v1273_v28 = vmax.f32 %v1237_v25, 0.0  ;;  %v1238_v35 = vadd.f32 %v1947_v4, %v1190_v14  ;;  %v1191_v63 = vadd.f32 %v1117_v26, %v999_v0  ;;  %v1000_v31 = vadd.f32 %v929_v57, %v1872_v18 }
 0x191   :  { %v931_v2 = vpop.f32.mrf.mxu0  ;;  %v1123_v20 = vpop.f32.mrf.mxu1 }
 0x192   :  { %1310 = vst.msk [vmem:[#allocation7 + $0x48] sm:$0xff] %vm1301_vm1, %v1273_v28  ;;  %v1274_v7 = vmax.f32 %v1238_v35, 0.0  ;;  %v1239_v46 = vadd.f32 %v1950_v3, %v1191_v63  ;;  %v1192_v10 = vadd.f32 %v1121_v30, %v1000_v31  ;;  %v1001_v40 = vadd.f32 %v931_v2, %v1875_v24 }
 0x193   :  { %v933_v11 = vpop.f32.mrf.mxu0  ;;  %v1125_v8 = vpop.f32.mrf.mxu1 }
 0x194   :  { %1311 = vst [vmem:[#allocation7 + $0x50] sm:$0xff] %v1274_v7  ;;  %v1275_v27 = vmax.f32 %v1239_v46, 0.0  ;;  %v1240_v49 = vadd.f32 %v1947_v4, %v1192_v10  ;;  %v1193_v13 = vadd.f32 %v1123_v20, %v1001_v40  ;;  %v1002_v12 = vadd.f32 %v933_v11, %v1878_v32 }
 0x195   :  { %v935_v18 = vpop.f32.mrf.mxu0  ;;  %v1127_v52 = vpop.f32.mrf.mxu1 }
 0x196   :  { %1312 = vst.msk [vmem:[#allocation7 + $0x58] sm:$0xff] %vm1301_vm1, %v1275_v27  ;;  %v1276_v53 = vmax.f32 %v1240_v49, 0.0  ;;  %v1241_v33 = vadd.f32 %v1950_v3, %v1193_v13  ;;  %v1194_v41 = vadd.f32 %v1125_v8, %v1002_v12  ;;  %v1003_v17 = vadd.f32 %v935_v18, %v1881_v38 }
 0x197   :  { %v939_v24 = vpop.f32.mrf.mxu0  ;;  %v1131_v55 = vpop.f32.mrf.mxu1 }
 0x198   :  { %1313 = vst [vmem:[#allocation7 + $0x60] sm:$0xff] %v1276_v53  ;;  %v1277_v61 = vmax.f32 %v1241_v33, 0.0  ;;  %v1242_v45 = vadd.f32 %v1947_v4, %v1194_v41  ;;  %v1195_v43 = vadd.f32 %v1127_v52, %v1003_v17  ;;  %v1004_v59 = vadd.f32 %v939_v24, %v1884_v47 }
 0x199   :  { %v941_v32 = vpop.f32.mrf.mxu0  ;;  %v1133_v21 = vpop.f32.mrf.mxu1 }
 0x19a   :  { %1314 = vst.msk [vmem:[#allocation7 + $0x68] sm:$0xff] %vm1301_vm1, %v1277_v61  ;;  %v1278_v50 = vmax.f32 %v1242_v45, 0.0  ;;  %v1243_v22 = vadd.f32 %v1950_v3, %v1195_v43  ;;  %v1196_v6 = vadd.f32 %v1131_v55, %v1004_v59  ;;  %v1005_v48 = vadd.f32 %v941_v32, %v1887_v56 }
 0x19b   :  { %v943_v38 = vpop.f32.mrf.mxu0  ;;  %v1135_v26 = vpop.f32.mrf.mxu1 }
 0x19c   :  { %1315 = vst [vmem:[#allocation7 + $0x70] sm:$0xff] %v1278_v50  ;;  %v1279_v54 = vmax.f32 %v1243_v22, 0.0  ;;  %v1244_v25 = vadd.f32 %v1947_v4, %v1196_v6  ;;  %v1197_v14 = vadd.f32 %v1133_v21, %v1005_v48  ;;  %v1006_v0 = vadd.f32 %v943_v38, %v1890_v1 }
 0x19d   :  { %v945_v47 = vpop.f32.mrf.mxu0  ;;  %v1137_v57 = vpop.f32.mrf.mxu1 }
 0x19e   :  { %1316 = vst.msk [vmem:[#allocation7 + $0x78] sm:$0xff] %vm1301_vm1, %v1279_v54  ;;  %v1280_v30 = vmax.f32 %v1244_v25, 0.0  ;;  %v1245_v28 = vadd.f32 %v1950_v3, %v1197_v14  ;;  %v1198_v35 = vadd.f32 %v1135_v26, %v1006_v0  ;;  %v1007_v63 = vadd.f32 %v945_v47, %v1893_v9 }
 0x19f   :  { %v949_v56 = vpop.f32.mrf.mxu0  ;;  %v1141_v31 = vpop.f32.mrf.mxu1 }
 0x1a0   :  { %1317 = vst [vmem:[#allocation7 + $0x80] sm:$0xff] %v1280_v30  ;;  %v1281_v2 = vmax.f32 %v1245_v28, 0.0  ;;  %v1246_v20 = vadd.f32 %v1947_v4, %v1198_v35  ;;  %v1199_v7 = vadd.f32 %v1137_v57, %v1007_v63  ;;  %v1008_v46 = vadd.f32 %v949_v56, %v1896_v15 }
 0x1a1   :  { %v951_v1 = vpop.f32.mrf.mxu0  ;;  %v1143_v10 = vpop.f32.mrf.mxu1 }
 0x1a2   :  { %1318 = vst.msk [vmem:[#allocation7 + $0x88] sm:$0xff] %vm1301_vm1, %v1281_v2  ;;  %v1282_v40 = vmax.f32 %v1246_v20, 0.0  ;;  %v1247_v11 = vadd.f32 %v1950_v3, %v1199_v7  ;;  %v1200_v8 = vadd.f32 %v1141_v31, %v1008_v46  ;;  %v1009_v27 = vadd.f32 %v951_v1, %v1899_v23 }
 0x1a3   :  { %v953_v9 = vpop.f32.mrf.mxu0  ;;  %v1145_v49 = vpop.f32.mrf.mxu1 }
 0x1a4   :  { %1319 = vst [vmem:[#allocation7 + $0x90] sm:$0xff] %v1282_v40  ;;  %v1283_v13 = vmax.f32 %v1247_v11, 0.0  ;;  %v1248_v12 = vadd.f32 %v1947_v4, %v1200_v8  ;;  %v1201_v18 = vadd.f32 %v1143_v10, %v1009_v27  ;;  %v1010_v52 = vadd.f32 %v953_v9, %v1902_v29 }
 0x1a5   :  { %v955_v15 = vpop.f32.mrf.mxu0  ;;  %v1147_v53 = vpop.f32.mrf.mxu1 }
 0x1a6   :  { %1320 = vst.msk [vmem:[#allocation7 + $0x98] sm:$0xff] %vm1301_vm1, %v1283_v13  ;;  %v1284_v33 = vmax.f32 %v1248_v12, 0.0  ;;  %v1249_v41 = vadd.f32 %v1950_v3, %v1201_v18  ;;  %v1202_v17 = vadd.f32 %v1145_v49, %v1010_v52  ;;  %v1011_v24 = vadd.f32 %v955_v15, %v1905_v36 }
 0x1a7   :  { %v959_v23 = vpop.f32.mrf.mxu0  ;;  %v1151_v55 = vpop.f32.mrf.mxu1 }
 0x1a8   :  { %1321 = vst [vmem:[#allocation7 + $0xa0] sm:$0xff] %v1284_v33  ;;  %v1285_v61 = vmax.f32 %v1249_v41, 0.0  ;;  %v1250_v45 = vadd.f32 %v1947_v4, %v1202_v17  ;;  %v1203_v43 = vadd.f32 %v1147_v53, %v1011_v24  ;;  %v1012_v59 = vadd.f32 %v959_v23, %v1908_v44 }
 0x1a9   :  { %v961_v29 = vpop.f32.mrf.mxu0  ;;  %v1153_v32 = vpop.f32.mrf.mxu1 }
 0x1aa   :  { %1322 = vst.msk [vmem:[#allocation7 + $0xa8] sm:$0xff] %vm1301_vm1, %v1285_v61  ;;  %v1286_v21 = vmax.f32 %v1250_v45, 0.0  ;;  %v1251_v50 = vadd.f32 %v1950_v3, %v1203_v43  ;;  %v1204_v22 = vadd.f32 %v1151_v55, %v1012_v59  ;;  %v1013_v6 = vadd.f32 %v961_v29, %v1911_v51 }
 0x1ab   :  { %v963_v36 = vpop.f32.mrf.mxu0  ;;  %v1155_v48 = vpop.f32.mrf.mxu1 }
 0x1ac   :  { %1323 = vst [vmem:[#allocation7 + $0xb0] sm:$0xff] %v1286_v21  ;;  %v1287_v38 = vmax.f32 %v1251_v50, 0.0  ;;  %v1252_v26 = vadd.f32 %v1947_v4, %v1204_v22  ;;  %v1205_v54 = vadd.f32 %v1153_v32, %v1013_v6  ;;  %v1014_v25 = vadd.f32 %v963_v36, %v1914_v60 }
 0x1ad   :  { %v965_v44 = vpop.f32.mrf.mxu0  ;;  %v1157_v14 = vpop.f32.mrf.mxu1 }
 0x1ae   :  { %1324 = vst.msk [vmem:[#allocation7 + $0xb8] sm:$0xff] %vm1301_vm1, %v1287_v38  ;;  %v1288_v0 = vmax.f32 %v1252_v26, 0.0  ;;  %v1253_v47 = vadd.f32 %v1950_v3, %v1205_v54  ;;  %v1206_v57 = vadd.f32 %v1155_v48, %v1014_v25  ;;  %v1015_v30 = vadd.f32 %v965_v44, %v1917_v5 }
 0x1af   :  { %v969_v51 = vpop.f32.mrf.mxu0  ;;  %v1161_v28 = vpop.f32.mrf.mxu1 }
 0x1b0   :  { %1325 = vst [vmem:[#allocation7 + $0xc0] sm:$0xff] %v1288_v0  ;;  %v1289_v35 = vmax.f32 %v1253_v47, 0.0  ;;  %v1254_v63 = vadd.f32 %v1947_v4, %v1206_v57  ;;  %v1207_v56 = vadd.f32 %v1157_v14, %v1015_v30  ;;  %v1016_v31 = vadd.f32 %v969_v51, %v1920_v39 }
 0x1b1   :  { %v971_v60 = vpop.f32.mrf.mxu0  ;;  %v1163_v2 = vpop.f32.mrf.mxu1 }
 0x1b2   :  { %1326 = vst.msk [vmem:[#allocation7 + $0xc8] sm:$0xff] %vm1301_vm1, %v1289_v35  ;;  %v1290_v20 = vmax.f32 %v1254_v63, 0.0  ;;  %v1255_v7 = vadd.f32 %v1950_v3, %v1207_v56  ;;  %v1208_v46 = vadd.f32 %v1161_v28, %v1016_v31  ;;  %v1017_v1 = vadd.f32 %v971_v60, %v1923_v42 }
 0x1b3   :  { %v973_v5 = vpop.f32.mrf.mxu0  ;;  %v1165_v10 = vpop.f32.mrf.mxu1 }
 0x1b4   :  { %1327 = vst [vmem:[#allocation7 + $0xd0] sm:$0xff] %v1290_v20  ;;  %v1291_v40 = vmax.f32 %v1255_v7, 0.0  ;;  %v1256_v11 = vadd.f32 %v1947_v4, %v1208_v46  ;;  %v1209_v8 = vadd.f32 %v1163_v2, %v1017_v1  ;;  %v1018_v27 = vadd.f32 %v973_v5, %v1926_v34 }
 0x1b5   :  { %v975_v39 = vpop.f32.mrf.mxu0  ;;  %v1167_v9 = vpop.f32.mrf.mxu1 }
 0x1b6   :  { %1328 = vst.msk [vmem:[#allocation7 + $0xd8] sm:$0xff] %vm1301_vm1, %v1291_v40  ;;  %v1292_v49 = vmax.f32 %v1256_v11, 0.0  ;;  %v1257_v13 = vadd.f32 %v1950_v3, %v1209_v8  ;;  %v1210_v12 = vadd.f32 %v1165_v10, %v1018_v27  ;;  %v1019_v18 = vadd.f32 %v975_v39, %v1929_v37 }
 0x1b7   :  { %v979_v42 = vpop.f32.mrf.mxu0  ;;  %v1171_v52 = vpop.f32.mrf.mxu1 }
 0x1b8   :  { %1329 = vst [vmem:[#allocation7 + $0xe0] sm:$0xff] %v1292_v49  ;;  %v1293_v15 = vmax.f32 %v1257_v13, 0.0  ;;  %v1258_v53 = vadd.f32 %v1947_v4, %v1210_v12  ;;  %v1211_v33 = vadd.f32 %v1167_v9, %v1019_v18  ;;  %v1020_v41 = vadd.f32 %v979_v42, %v1932_v16 }
 0x1b9   :  { %v981_v34 = vpop.f32.mrf.mxu0  ;;  %v1173_v17 = vpop.f32.mrf.mxu1 }
 0x1ba   :  { %1330 = vst.msk [vmem:[#allocation7 + $0xe8] sm:$0xff] %vm1301_vm1, %v1293_v15  ;;  %v1294_v24 = vmax.f32 %v1258_v53, 0.0  ;;  %v1259_v23 = vadd.f32 %v1950_v3, %v1211_v33  ;;  %v1212_v55 = vadd.f32 %v1171_v52, %v1020_v41  ;;  %v1021_v61 = vadd.f32 %v981_v34, %v1935_v19 }
 0x1bb   :  { %v983_v37 = vpop.f32.mrf.mxu0  ;;  %v1175_v45 = vpop.f32.mrf.mxu1 }
 0x1bc   :  { %1331 = vst [vmem:[#allocation7 + $0xf0] sm:$0xff] %v1294_v24  ;;  %v1295_v43 = vmax.f32 %v1259_v23, 0.0  ;;  %v1260_v59 = vadd.f32 %v1947_v4, %v1212_v55  ;;  %v1213_v29 = vadd.f32 %v1173_v17, %v1021_v61  ;;  %v1022_v32 = vadd.f32 %v983_v37, %v1941_v62 }
 0x1bd   :  { %v985_v16 = vpop.f32.mrf.mxu0  ;;  %v1177_v36 = vpop.f32.mrf.mxu1 }
 0x1be   :  { %1332 = vst.msk [vmem:[#allocation7 + $0xf8] sm:$0xff] %vm1301_vm1, %v1295_v43  ;;  %v1296_v21 = vmax.f32 %v1260_v59, 0.0  ;;  %v1261_v50 = vadd.f32 %v1950_v3, %v1213_v29  ;;  %v1214_v22 = vadd.f32 %v1175_v45, %v1022_v32  ;;  %v1023_v6 = vadd.f32 %v985_v16, %v1944_v58 }
 0x1c0   :  { %1333 = vst [vmem:[#allocation7 + $0x100] sm:$0xff] %v1296_v21  ;;  %v1297_v19 = vmax.f32 %v1261_v50, 0.0  ;;  %v1262_v48 = vadd.f32 %v1947_v4, %v1214_v22  ;;  %v1215_v38 = vadd.f32 %v1177_v36, %v1023_v6 }
 0x1c2   :  { %1334 = vst.msk [vmem:[#allocation7 + $0x108] sm:$0xff] %vm1301_vm1, %v1297_v19  ;;  %v1298_v62 = vmax.f32 %v1262_v48, 0.0  ;;  %v1263_v26 = vadd.f32 %v1950_v3, %v1215_v38 }
 0x1c4   :  { %1335 = vst [vmem:[#allocation7 + $0x110] sm:$0xff] %v1298_v62  ;;  %v1299_v54 = vmax.f32 %v1263_v26, 0.0 }
 0x1c6   :  { %1336 = vst.msk [vmem:[#allocation7 + $0x118] sm:$0xff] %vm1301_vm1, %v1299_v54 }
 0x1c7   :  { %1558 = shalt.err (!%p1555_p0)
}
 0x1c8   :  { %s1581_s28 = smov 256   ;;  %s1582_s29 = smov 16  }
 0x1c9   :  { %1348 = dma.vmem_to_hbm [thread:$0]  %s1343_s26, 4608, %s2046_s3, [#allocation4], %s1581_s28, %s1581_s28, %s1582_s29  }
 0x1ca   :  { %1571 = dma.done.wait [#allocation4], 4608  }
 0x1cb   :  { %1572 = vsyncadd [#allocation4], 4294962688 }
 0x1cc   :  { %1352 = vsyncpa [#allocation3], 1 }
 0x1cd   :  { %1353 = vsyncpa [#allocation6], 1 }
 0x1ce   :  { %1354 = vsyncpa [#allocation4], 1 }

</bundles_post_ra>
